<compile_context>
chip_gen: v7x
topology: tpu7x:2x2x1
jax: 0.10.0
libtpu: 0.0.40
codegen_flags: <defaults>
</compile_context>

<pallas_src>
import math
import functools

import jax
import jax.numpy as jnp
from jax import lax
from jax.experimental import pallas as pl
from jax.experimental.pallas import tpu as pltpu

_INV_SQRT2 = 1.0 / math.sqrt(2.0)

_VMEM_BUDGET = 40 * 1024 * 1024   # target working set (fits under v7x 64 MiB)
_VMEM_LIMIT = 48 * 1024 * 1024    # scoped-VMEM limit handed to Mosaic
_TM_TARGET = 2048                 # rows per grid step (amortizes per-step cost)


def _mlp_kernel(x_ref, w1_ref, b1_ref, w2_ref, b2_ref, o_ref):
    # x_ref: [TM, D] caller dtype | w1: [D, F] bf16 | b1: [1, F] f32
    # w2: [F, D] bf16             | b2: [1, D] f32  | o_ref: [TM, D] caller dtype
    x = x_ref[...].astype(jnp.bfloat16)
    # Linear1: bf16 operands, f32 accumulate on the MXU.
    h = jnp.dot(x, w1_ref[...], preferred_element_type=jnp.float32)
    h = h + b1_ref[...]
    # Exact (erf) GELU in f32, matching torch.nn.GELU() default.
    h = 0.5 * h * (1.0 + lax.erf(h * _INV_SQRT2))
    # Linear2: cast activation to bf16 for the MXU, accumulate in f32.
    y = jnp.dot(h.astype(jnp.bfloat16), w2_ref[...],
                preferred_element_type=jnp.float32)
    y = y + b2_ref[...]
    # Dropout: inference mode -> identity.
    o_ref[...] = y.astype(o_ref.dtype)


def _choose_tm(m, d_new, ffh, x_bytes, out_bytes):
    """Pick the token-tile row count from a VMEM budget."""
    # Resident (single-buffered) bf16 weights + f32 biases.
    weight_bytes = 2 * d_new * ffh * 2 + (d_new + ffh) * 4
    # Per-row VMEM: double-buffered x & out tiles + f32/bf16 intermediates.
    per_row = d_new * (2 * x_bytes + 2 * out_bytes + 2 + 4) + ffh * (4 + 2)
    rows = max((_VMEM_BUDGET - weight_bytes) // max(per_row, 1), 8)
    tm = int(min(_TM_TARGET, rows))
    return max(8, (tm // 8) * 8)


@functools.partial(jax.jit, static_argnames=("tm",))
def latent_mlp_rl_forward(x, params, tm=None):
    """x: [..., d_new]; params from prepare_latent_mlp_params:
       w1: [d_new, ffh] bf16, b1: [1, ffh] f32, w2: [ffh, d_new] bf16, b2: [1, d_new] f32."""
    w1, b1, w2, b2 = params
    orig_shape = x.shape
    d_new = orig_shape[-1]
    ffh = w1.shape[1]

    x2d = x.reshape(-1, d_new)          # metadata-only for contiguous x
    m = x2d.shape[0]
    x_bytes = x2d.dtype.itemsize
    out_bytes = x_bytes                 # output stored in the caller's dtype

    if tm is None:
        tm = _choose_tm(m, d_new, ffh, x_bytes, out_bytes)
    if tm >= m:
        tm = m                          # single block == full dim (always legal)
    else:
        tm = max(8, (tm // 8) * 8)      # sublane-aligned; ragged last block masked

    grid = (pl.cdiv(m, tm),)

    cost = pl.CostEstimate(
        flops=4 * m * d_new * ffh,                       # two matmuls
        transcendentals=m * ffh,                         # erf
        bytes_accessed=(m * d_new * (x_bytes + out_bytes)
                        + 2 * d_new * ffh * 2            # bf16 weights
                        + (d_new + ffh) * 4),            # f32 biases
    )

    out = pl.pallas_call(
        _mlp_kernel,
        out_shape=jax.ShapeDtypeStruct((m, d_new), x.dtype),
        grid=grid,
        in_specs=[
            # x tile moves with the grid (double-buffered by default).
            pl.BlockSpec((tm, d_new), lambda i: (i, 0)),
            # Weights / biases: constant index map => VMEM-resident; single-buffered.
            pl.BlockSpec((d_new, ffh), lambda i: (0, 0),
                         pipeline_mode=pl.Buffered(1)),
            pl.BlockSpec((1, ffh), lambda i: (0, 0),
                         pipeline_mode=pl.Buffered(1)),
            pl.BlockSpec((ffh, d_new), lambda i: (0, 0),
                         pipeline_mode=pl.Buffered(1)),
            pl.BlockSpec((1, d_new), lambda i: (0, 0),
                         pipeline_mode=pl.Buffered(1)),
        ],
        out_specs=pl.BlockSpec((tm, d_new), lambda i: (i, 0)),
        compiler_params=pltpu.CompilerParams(
            dimension_semantics=("parallel",),   # megacore-shardable on v7x
            vmem_limit_bytes=_VMEM_LIMIT,
        ),
        cost_estimate=cost,
    )(x2d, w1, b1, w2, b2)

    return out.reshape(orig_shape)


def prepare_latent_mlp_params(w1, b1, w2, b2):
    """One-time parameter preparation (hoisted out of the forward).

    Takes torch-layout params (w: [out_features, in_features], b: [out_features])
    and returns MXU-ready params: pre-transposed (in, out) bf16 weights and
    (1, out) f32 biases."""
    w1p = jnp.asarray(w1).T.astype(jnp.bfloat16)          # [d_new, ffh]
    b1p = jnp.asarray(b1).reshape(1, -1).astype(jnp.float32)
    w2p = jnp.asarray(w2).T.astype(jnp.bfloat16)          # [ffh, d_new]
    b2p = jnp.asarray(b2).reshape(1, -1).astype(jnp.float32)
    return w1p, b1p, w2p, b2p


def init_latent_mlp_params(key, d_new, ff_latent_hidden, bias=True,
                           dtype=jnp.float32):
    """Deterministic init mirroring nn.Linear defaults (torch layout):
       weight [out, in], bias [out], U(-1/sqrt(fan_in), 1/sqrt(fan_in))."""
    k1, k2, k3, k4 = jax.random.split(key, 4)
    bound1 = 1.0 / math.sqrt(d_new)
    bound2 = 1.0 / math.sqrt(ff_latent_hidden)
    w1 = jax.random.uniform(k1, (ff_latent_hidden, d_new), dtype,
                            minval=-bound1, maxval=bound1)
    w2 = jax.random.uniform(k2, (d_new, ff_latent_hidden), dtype,
                            minval=-bound2, maxval=bound2)
    if bias:
        b1 = jax.random.uniform(k3, (ff_latent_hidden,), dtype,
                                minval=-bound1, maxval=bound1)
        b2 = jax.random.uniform(k4, (d_new,), dtype,
                                minval=-bound2, maxval=bound2)
    else:
        b1 = jnp.zeros((ff_latent_hidden,), dtype)
        b2 = jnp.zeros((d_new,), dtype)
    return w1, b1, w2, b2


def _reference(x, w1, b1, w2, b2):
    """Pure-JAX reference with the same bf16 operand rounding / f32 accumulation."""
    xb = x.astype(jnp.bfloat16).astype(jnp.float32)
    w1b = w1.astype(jnp.bfloat16).astype(jnp.float32)
    w2b = w2.astype(jnp.bfloat16).astype(jnp.float32)
    h = jnp.einsum("btd,fd->btf", xb, w1b,
                   precision=lax.Precision.HIGHEST,
                   preferred_element_type=jnp.float32) + b1
    h = 0.5 * h * (1.0 + lax.erf(h * _INV_SQRT2))
    h = h.astype(jnp.bfloat16).astype(jnp.float32)
    y = jnp.einsum("btf,df->btd", h, w2b,
                   precision=lax.Precision.HIGHEST,
                   preferred_element_type=jnp.float32) + b2
    return y.astype(x.dtype)


if __name__ == "__main__":
    # Small shapes consistent with the module: latent dim d_new, hidden ffh.
    B, T = 2, 8
    d_new, ff_latent_hidden = 32, 64
    dropout, bias = 0.1, True  # dropout inactive (inference mode)

    key = jax.random.PRNGKey(0)
    kx, kp = jax.random.split(key)
    x = jax.random.normal(kx, (B, T, d_new), jnp.float32)

    raw = init_latent_mlp_params(kp, d_new, ff_latent_hidden, bias)
    params = prepare_latent_mlp_params(*raw)   # one-time prep (hoisted)

    y = latent_mlp_rl_forward(x, params)
    y = jax.block_until_ready(y)
    assert y.shape == (B, T, d_new)
    assert y.dtype == x.dtype

    y_ref = _reference(x, *raw)
    assert jnp.allclose(y, y_ref, atol=1e-2, rtol=1e-2), (
        float(jnp.max(jnp.abs(y - y_ref))))

    # Also exercise the ragged-grid path (M=24, tm=16 -> last block masked).
    x2 = jax.random.normal(jax.random.PRNGKey(1), (2, 12, d_new), jnp.float32)
    y2 = jax.block_until_ready(latent_mlp_rl_forward(x2, params, tm=16))
    y2_ref = _reference(x2, *raw)
    assert jnp.allclose(y2, y2_ref, atol=1e-2, rtol=1e-2), (
        float(jnp.max(jnp.abs(y2 - y2_ref))))

    print("KERNEL_OK")
</pallas_src>

<mosaic_0001>
module attributes {stable_mosaic.version = 11 : i64} {
  func.func @_mlp_kernel(%arg0: i32, %arg1: memref<16x32xf32, #tpu.memory_space<vmem>>, %arg2: memref<32x64xbf16, #tpu.memory_space<vmem>>, %arg3: memref<1x64xf32, #tpu.memory_space<vmem>>, %arg4: memref<64x32xbf16, #tpu.memory_space<vmem>>, %arg5: memref<1x32xf32, #tpu.memory_space<vmem>>, %arg6: memref<16x32xf32, #tpu.memory_space<vmem>>) attributes {dimension_semantics = [#tpu.dimension_semantics<parallel>], iteration_bounds = array<i64: 1>, scalar_prefetch = 0 : i64, scratch_operands = 0 : i64, tpu.core_type = #tpu.core_type<tc>, window_params = [{transform_indices = @transform_0, window_bounds = array<i64: 16, 32>}, {pipeline_mode = #tpu.pipeline_mode<synchronous>, transform_indices = @transform_1, window_bounds = array<i64: 32, 64>}, {pipeline_mode = #tpu.pipeline_mode<synchronous>, transform_indices = @transform_2, window_bounds = array<i64: 1, 64>}, {pipeline_mode = #tpu.pipeline_mode<synchronous>, transform_indices = @transform_3, window_bounds = array<i64: 64, 32>}, {pipeline_mode = #tpu.pipeline_mode<synchronous>, transform_indices = @transform_4, window_bounds = array<i64: 1, 32>}, {transform_indices = @transform_5, window_bounds = array<i64: 16, 32>}]} {
    %c0 = arith.constant 0 : index
    %c0_0 = arith.constant 0 : index
    %0 = vector.load %arg1[%c0, %c0_0] : memref<16x32xf32, #tpu.memory_space<vmem>>, vector<16x32xf32>
    %1 = arith.truncf %0 : vector<16x32xf32> to vector<16x32xbf16>
    %c0_1 = arith.constant 0 : index
    %c0_2 = arith.constant 0 : index
    %2 = vector.load %arg2[%c0_1, %c0_2] : memref<32x64xbf16, #tpu.memory_space<vmem>>, vector<32x64xbf16>
    %cst = arith.constant dense<0.000000e+00> : vector<16x64xf32>
    %3 = tpu.matmul %1, %2, %cst {dimension_numbers = #tpu.dot_dimension_numbers<[1], [0], [0], [1], [0, 0, 1, 1], [], []>} : vector<16x32xbf16>, vector<32x64xbf16>, vector<16x64xf32> -> vector<16x64xf32>
    %c0_3 = arith.constant 0 : index
    %c0_4 = arith.constant 0 : index
    %4 = vector.load %arg3[%c0_3, %c0_4] : memref<1x64xf32, #tpu.memory_space<vmem>>, vector<1x64xf32>
    %5 = vector.broadcast %4 : vector<1x64xf32> to vector<16x64xf32>
    %6 = arith.addf %3, %5 : vector<16x64xf32>
    %cst_5 = arith.constant 5.000000e-01 : f32
    %7 = vector.broadcast %cst_5 : f32 to vector<16x64xf32>
    %8 = arith.mulf %7, %6 : vector<16x64xf32>
    %cst_6 = arith.constant 0.707106769 : f32
    %9 = vector.broadcast %cst_6 : f32 to vector<16x64xf32>
    %10 = arith.mulf %6, %9 : vector<16x64xf32>
    %11 = math.erf %10 : vector<16x64xf32>
    %cst_7 = arith.constant 1.000000e+00 : f32
    %12 = vector.broadcast %cst_7 : f32 to vector<16x64xf32>
    %13 = arith.addf %12, %11 : vector<16x64xf32>
    %14 = arith.mulf %8, %13 : vector<16x64xf32>
    %15 = arith.truncf %14 : vector<16x64xf32> to vector<16x64xbf16>
    %c0_8 = arith.constant 0 : index
    %c0_9 = arith.constant 0 : index
    %16 = vector.load %arg4[%c0_8, %c0_9] : memref<64x32xbf16, #tpu.memory_space<vmem>>, vector<64x32xbf16>
    %cst_10 = arith.constant dense<0.000000e+00> : vector<16x32xf32>
    %17 = tpu.matmul %15, %16, %cst_10 {dimension_numbers = #tpu.dot_dimension_numbers<[1], [0], [0], [1], [0, 0, 1, 1], [], []>} : vector<16x64xbf16>, vector<64x32xbf16>, vector<16x32xf32> -> vector<16x32xf32>
    %c0_11 = arith.constant 0 : index
    %c0_12 = arith.constant 0 : index
    %18 = vector.load %arg5[%c0_11, %c0_12] : memref<1x32xf32, #tpu.memory_space<vmem>>, vector<1x32xf32>
    %19 = vector.broadcast %18 : vector<1x32xf32> to vector<16x32xf32>
    %20 = arith.addf %17, %19 : vector<16x32xf32>
    %c0_13 = arith.constant 0 : index
    %c0_14 = arith.constant 0 : index
    %21 = vector.load %arg6[%c0_13, %c0_14] : memref<16x32xf32, #tpu.memory_space<vmem>>, vector<16x32xf32>
    tpu.vector_store %arg6[%c0_13, %c0_14], %20 {strides = array<i32>} : memref<16x32xf32, #tpu.memory_space<vmem>>, vector<16x32xf32>,
    return
  }
  func.func @transform_0(%arg0: i32) -> (i32, i32) {
    %c0_i32 = arith.constant 0 : i32
    %c0_i32_0 = arith.constant 0 : i32
    return %arg0, %c0_i32 : i32, i32
  }
  func.func @transform_1(%arg0: i32) -> (i32, i32) {
    %c0_i32 = arith.constant 0 : i32
    %c0_i32_0 = arith.constant 0 : i32
    %c0_i32_1 = arith.constant 0 : i32
    return %c0_i32, %c0_i32_0 : i32, i32
  }
  func.func @transform_2(%arg0: i32) -> (i32, i32) {
    %c0_i32 = arith.constant 0 : i32
    %c0_i32_0 = arith.constant 0 : i32
    %c0_i32_1 = arith.constant 0 : i32
    return %c0_i32, %c0_i32_0 : i32, i32
  }
  func.func @transform_3(%arg0: i32) -> (i32, i32) {
    %c0_i32 = arith.constant 0 : i32
    %c0_i32_0 = arith.constant 0 : i32
    %c0_i32_1 = arith.constant 0 : i32
    return %c0_i32, %c0_i32_0 : i32, i32
  }
  func.func @transform_4(%arg0: i32) -> (i32, i32) {
    %c0_i32 = arith.constant 0 : i32
    %c0_i32_0 = arith.constant 0 : i32
    %c0_i32_1 = arith.constant 0 : i32
    return %c0_i32, %c0_i32_0 : i32, i32
  }
  func.func @transform_5(%arg0: i32) -> (i32, i32) {
    %c0_i32 = arith.constant 0 : i32
    %c0_i32_0 = arith.constant 0 : i32
    return %arg0, %c0_i32 : i32, i32
  }
}

</mosaic_0001>

<bundles_post_ra>
// kernel: latent_mlp_rl_forward.1
= control target key start
LH: loop header
LB: loop body
LE: loop exit
PB: predicated region body
PF: predicated region fallthrough
CT: control target
= control target key end

     0   :  { %v283_v1 = vmov 0.0   ;;  %vm284_vm0 = vmmov 0   ;;  %s363_s0 = inlined_call_operand.vmem [shape: f32[16,32], index: 0, kind: input, shape index: {}]   ;;  %s364_s1 = inlined_call_operand.vmem [shape: bf16[32,64], index: 1, kind: input, shape index: {}]   ;;  %s365_s2 = inlined_call_operand.vmem [shape: f32[1,64], index: 2, kind: input, shape index: {}]   ;;  %s366_s3 = inlined_call_operand.vmem [shape: bf16[64,32], index: 3, kind: input, shape index: {}]   ;;  %s367_s4 = inlined_call_operand.vmem [shape: f32[1,32], index: 4, kind: input, shape index: {}]   ;;  %s368_s5 = inlined_call_operand.hbm [shape: f32[16,32], index: 5, kind: output, shape index: {}]  }
   0x1   :  { %v249_v0 = vld [vmem:[%s364_s1] sm:$0xff]   ;;  %224 = vmatprep.subr.bf16.mxu0 %v283_v1  ;;  %232 = vmatprep.subr.bf16.mxu1 %v283_v1  ;;  %v250_v2 = vld [vmem:[%s364_s1 + $0x8] sm:$0xff]  }
   0x2   :  { %225 = vmatpush3.bf16.msra.mxu0 %v249_v0  ;;  %228 = vmatprep.mubr.msk.bf16.mxu0 %vm284_vm0, %v283_v1  ;;  %v22_v3 = vld [vmem:[%s363_s0] sm:$0xff]  ;;  %v23_v4 = vld [vmem:[%s363_s0 + $0x8] sm:$0xff] }
   0x3   :  { %226 = vmatprep.subr.bf16.mxu0 %v283_v1  ;;  %240 = vmatprep.mubr.msk.bf16.mxu1 %vm284_vm0, %v283_v1  ;;  %v24_v5 = vpack.c.bf16 %v23_v4, %v22_v3 }
   0x4   :  { %10 = vsyncpa [#allocation3], 0  ;;  %vm48_vm1 = vcmask 261120   ;;  %v251_v6 = vld [vmem:[%s366_s3] sm:$0xff]   ;;  %v252_v7 = vld [vmem:[%s366_s3 + $0x8] sm:$0xff]   ;;  %vm143_vm2 = vcmask 523264  }
   0x5   :  { %233 = vmatpush3.bf16.msra.mxu1 %v251_v6  ;;  %v253_v8 = vld [vmem:[%s366_s3 + $0x10] sm:$0xff]   ;;  %v254_v9 = vld [vmem:[%s366_s3 + $0x18] sm:$0xff]   ;;  %v206_v10 = vld [vmem:[%s365_s2] ss:$0 sm:$0xff]  ;;  %s285_s9 = smov [#allocation2]  }
   0x6   :  { %227 = vmatpush3.bf16.msra.mxu0 %v250_v2  ;;  %234 = vmatprep.subr.bf16.mxu1 %v283_v1  ;;  %v210_v28 = vld [vmem:[%s367_s4] ss:$0 sm:$0xff]  ;;  %s195_s10 = sshll.u32 %s285_s9, 4  ;;  %s196_s10 = int_to_ptr.vmem [resolvable:$true] %s195_s10 }
   0x7   :  { %s259_s11 = scalar_lea.vmem %s196_s10, 256  ;;  %p264_p1 = scmp.lt.s32.totalorder %s196_s10, %s196_s10 }
   0x8   :  { %p260_p0 = scmp.ne.s32.totalorder %s196_s10, %s259_s11  ;;  %p265_p2 = scmp.lt.s32.totalorder %s259_s11, %s259_s11 }
   0x9   :  { %229 = vmatmul.mubr.msk.bf16.vlgmr.msra.gmra.mrb[0].mxu0 %vm48_vm1, %v24_v5  ;;  %235 = vmatpush3.bf16.msra.mxu1 %v252_v7 }
   0xa   :  { %236 = vmatprep.subr.bf16.mxu1 %v283_v1  ;;  %p266_p3 = por %p265_p2, %p264_p1 }
   0xc   :  { %p267_p4 = pnand %p266_p3, %p260_p0 }
   0xd   :  { %237 = vmatpush3.bf16.msra.mxu1 %v253_v8 }
   0xe   :  { %238 = vmatprep.subr.bf16.mxu1 %v283_v1 }
  0x11   :  { %239 = vmatpush3.bf16.msra.mxu1 %v254_v9 }
  0xdc   :  { %v86_v11 = vpop.f32.mrb[0].mxu0 }
  0xdd   :  { %v87_v12 = vadd.f32 %v206_v10, %v86_v11  ;;  %v230_v13 = vpop.f32.mrb[1].mxu0 }
  0xde   :  { %v89_v14 = vpop.f32.mrb[2].mxu0 }
  0xdf   :  { %v95_v15 = vmul.f32 0.70710677, %v87_v12  ;;  %v90_v16 = vadd.f32 %v206_v10, %v89_v14  ;;  %v231_v17 = vpop.f32.mrb[3].mxu0  ;;  %v93_v22 = vmul.f32 0.5, %v87_v12 }
  0xe1   :  { %255 = verf.f32 %v95_v15  ;;  %v96_v18 = vmul.f32 0.70710677, %v90_v16  ;;  %v94_v23 = vmul.f32 0.5, %v90_v16 }
  0xe3   :  { %257 = verf.f32 %v96_v18 }
  0xeb   :  { %v256_v19 = vpop.eup %255 }
  0xec   :  { %v99_v20 = vadd.f32 1.0, %v256_v19 }
  0xed   :  { %v258_v21 = vpop.eup %257 }
  0xee   :  { %v100_v24 = vadd.f32 1.0, %v258_v21  ;;  %v101_v25 = vmul.f32 %v99_v20, %v93_v22 }
  0xf0   :  { %v102_v26 = vmul.f32 %v100_v24, %v94_v23 }
  0xf2   :  { %v103_v27 = vpack.c.bf16 %v102_v26, %v101_v25 }
  0xf4   :  { %241 = vmatmul.mubr.msk.bf16.vlgmr.msra.gmra.mrb[0].mxu1 %vm143_vm2, %v103_v27 }
 0x1c7   :  { %v181_v29 = vpop.f32.mrb[0].mxu1 }
 0x1c8   :  { %v182_v30 = vadd.f32 %v210_v28, %v181_v29  ;;  %v242_v31 = vpop.f32.mrb[1].mxu1 }
 0x1c9   :  { %v184_v32 = vpop.f32.mrb[2].mxu1 }
 0x1ca   :  { %188 = vst.msk [vmem:[#allocation2] sm:$0xff] %vm48_vm1, %v182_v30  ;;  %v185_v33 = vadd.f32 %v210_v28, %v184_v32  ;;  %v243_v34 = vpop.f32.mrb[3].mxu1 }
 0x1cc   :  { %189 = vst.msk [vmem:[#allocation2 + $0x8] sm:$0xff] %vm48_vm1, %v185_v33 }
 0x1cd   :  { %270 = shalt.err (!%p267_p4)
}
 0x1ce   :  { %s271_s13 = scalar_lea.hbm %s368_s5, 256 }
 0x1cf   :  { %p272_p5 = scmp.ne.s32.totalorder %s368_s5, %s271_s13  ;;  %p275_p6 = scmp.lt.u32.totalorder %s271_s13, %s368_s5 }
 0x1d1   :  { %p277_p7 = pnand %p275_p6, %p272_p5 }
 0x1d3   :  { %280 = shalt.err (!%p277_p7)
}
 0x1d4   :  { %s286_s18 = smov 128   ;;  %s287_s19 = smov 8  }
 0x1d5   :  { %201 = dma.vmem_to_hbm [thread:$0]  %s196_s10, 256, %s368_s5, [#allocation3], %s286_s18, %s286_s18, %s287_s19  }
 0x1d6   :  { %281 = dma.done.wait [#allocation3], 256  }
 0x1d7   :  { %282 = vsyncadd [#allocation3], 4294967040 }
 0x1d8   :  { %205 = vsyncpa [#allocation3], 1 }

</bundles_post_ra>
